<compile_context>
chip_gen: v5e
topology: v5e:2x2
jax: 0.10.0
libtpu: 0.0.40
codegen_flags: <defaults>
</compile_context>

<pallas_src>
import jax
import jax.numpy as jnp
from jax import lax
from jax.experimental import pallas as pl
from jax.experimental.pallas import tpu as pltpu


# ---------------------------------------------------------------------------
# Fused TCN kernel: all temporal blocks for one batch chunk per grid step.
# ---------------------------------------------------------------------------
def _make_tcn_kernel(block_meta, kernel_size, seq_len):
    """block_meta: static tuple of (c_in, c_out, dilation, has_downsample)."""

    def kernel(x_ref, tpos_ref, *refs):
        o_ref = refs[-1]
        w = refs[:-1]
        # per-sample time index along the lane axis (precomputed on host)
        tpos = tpos_ref[...]                       # (1, n_lanes) int32
        masks = {}                                 # memoized per static shift

        def causal_mask(s):
            if s not in masks:
                masks[s] = tpos >= s
            return masks[s]

        def causal_shift(v, s):
            # y[:, b*L + t] = v[:, b*L + t - s] for t >= s, else 0 (static s).
            # The mask also zeroes the roll wrap-around between samples.
            if s == 0:
                return v
            rolled = pltpu.roll(v, shift=s, axis=1)    # lane rotate (XLU)
            return jnp.where(causal_mask(s), rolled, 0.0)

        def dilated_causal_conv(v, w_ref, b_ref, dil, c_out):
            # PyTorch Conv1d(pad=(K-1)*dil) + Chomp1d (causal):
            #   y[:, t] = sum_j W_j @ v[:, t - (K-1-j)*dil]  (+ bias)
            n = v.shape[1]
            acc = jnp.zeros((c_out, n), jnp.float32)
            for j in range(kernel_size):
                s = (kernel_size - 1 - j) * dil
                if s >= seq_len:
                    continue       # tap lies entirely in the causal zero-pad
                tap = causal_shift(v, s).astype(jnp.bfloat16)
                acc = acc + jnp.dot(w_ref[j], tap,
                                    preferred_element_type=jnp.float32)
            return acc + b_ref[...]

        h = x_ref[...]                             # (c_in0, n_lanes), f32
        wi = 0
        for (c_in, c_out, dil, has_ds) in block_meta:
            w1_ref, b1_ref, w2_ref, b2_ref = (w[wi], w[wi + 1],
                                              w[wi + 2], w[wi + 3])
            wi += 4
            inp = h
            # conv1 -> ReLU -> Dropout(id) -> conv2 -> ReLU -> Dropout(id)
            h1 = jnp.maximum(
                dilated_causal_conv(inp, w1_ref, b1_ref, dil, c_out), 0.0)
            h2 = jnp.maximum(
                dilated_causal_conv(h1, w2_ref, b2_ref, dil, c_out), 0.0)
            # residual (1x1 conv iff channel counts differ) + final ReLU
            if has_ds:
                wd_ref, bd_ref = w[wi], w[wi + 1]
                wi += 2
                res = jnp.dot(wd_ref[...], inp.astype(jnp.bfloat16),
                              preferred_element_type=jnp.float32) + bd_ref[...]
            else:
                res = inp
            h = jnp.maximum(h2 + res, 0.0)
        o_ref[...] = h                             # (c_last, n_lanes)

    return kernel


def _pick_samples_per_chunk(B, L, target_lanes=1024):
    """Samples per grid step.  Chunk lane width must be a multiple of 128
    (Mosaic block-shape rule) unless the chunk is the whole batch."""
    cands = [s for s in range(1, B + 1)
             if B % s == 0 and (s == B or (s * L) % 128 == 0)]
    fitting = [s for s in cands if s * L <= target_lanes]
    return max(fitting) if fitting else min(cands)


def tcn_forward(x, blocks):
    """x: (B, C_in, L) f32 (PyTorch NCW) -> z: (C_last, B*L); one pallas_call."""
    B, c0, L = x.shape
    K = blocks[0]["w1"].shape[0]

    spc = _pick_samples_per_chunk(B, L)            # samples per grid step
    n_chunks = B // spc
    n_lanes = spc * L

    # NCW batch -> channels on sublanes, (sample, time) concatenated on lanes.
    xt = jnp.transpose(x, (1, 0, 2)).reshape(c0, B * L)
    # per-sample time index (same for every chunk; avoids in-kernel modulo)
    tpos = jnp.tile(jnp.arange(L, dtype=jnp.int32), spc)[None, :]

    block_meta = []
    args = []
    in_specs = [pl.BlockSpec((c0, n_lanes), lambda i: (0, i)),
                pl.BlockSpec((1, n_lanes), lambda i: (0, 0))]
    c_in = c0
    for bi, blk in enumerate(blocks):
        c_out = blk["w1"].shape[1]
        dil = 2 ** bi
        has_ds = c_in != c_out
        block_meta.append((c_in, c_out, dil, has_ds))
        # bf16 MXU operands (f32 accumulation in-kernel); biases stay f32.
        args += [blk["w1"].astype(jnp.bfloat16), blk["b1"],
                 blk["w2"].astype(jnp.bfloat16), blk["b2"]]
        in_specs += [
            pl.BlockSpec((K, c_out, c_in), lambda i: (0, 0, 0)),
            pl.BlockSpec((c_out, 1), lambda i: (0, 0)),
            pl.BlockSpec((K, c_out, c_out), lambda i: (0, 0, 0)),
            pl.BlockSpec((c_out, 1), lambda i: (0, 0)),
        ]
        if has_ds:   # only DMA the 1x1 downsample weights when they exist
            args += [blk["wd"].astype(jnp.bfloat16), blk["bd"]]
            in_specs += [pl.BlockSpec((c_out, c_in), lambda i: (0, 0)),
                         pl.BlockSpec((c_out, 1), lambda i: (0, 0))]
        c_in = c_out

    kernel = _make_tcn_kernel(tuple(block_meta), K, L)
    return pl.pallas_call(
        kernel,
        out_shape=jax.ShapeDtypeStruct((c_in, B * L), jnp.float32),
        grid=(n_chunks,),
        in_specs=in_specs,
        out_specs=pl.BlockSpec((c_in, n_lanes), lambda i: (0, i)),
        compiler_params=pltpu.CompilerParams(
            dimension_semantics=("parallel",)),
    )(xt, tpos, *args)


# ---------------------------------------------------------------------------
# Projection MLP kernel (whole batch, M = B)
# ---------------------------------------------------------------------------
def projection_kernel(x_ref, w1_ref, b1_ref, w2_ref, b2_ref, w3_ref, b3_ref,
                      o_ref):
    """Linear -> ReLU -> Linear -> ReLU -> Linear; f32 accumulate."""
    h = jnp.dot(x_ref[...].astype(jnp.bfloat16), w1_ref[...],
                preferred_element_type=jnp.float32) + b1_ref[...]
    h = jnp.maximum(h, 0.0)
    h = jnp.dot(h.astype(jnp.bfloat16), w2_ref[...],
                preferred_element_type=jnp.float32) + b2_ref[...]
    h = jnp.maximum(h, 0.0)
    o_ref[...] = jnp.dot(h.astype(jnp.bfloat16), w3_ref[...],
                         preferred_element_type=jnp.float32) + b3_ref[...]


def projection(x, p):
    """x: (B, feat_size) -> (B, proj_size)."""
    # TODO(synk): for large feat_size (>~4K) w1/w2 should be tiled over the
    #             reduction / output dims with an f32 VMEM accumulator and
    #             pl.when init/finalize, sized for v7x's 64 MiB VMEM.
    B = x.shape[0]
    proj_size = p["w3"].shape[1]
    return pl.pallas_call(
        projection_kernel,
        out_shape=jax.ShapeDtypeStruct((B, proj_size), jnp.float32),
    )(x, p["w1"].astype(jnp.bfloat16), p["b1"],
      p["w2"].astype(jnp.bfloat16), p["b2"],
      p["w3"].astype(jnp.bfloat16), p["b3"])


def timeseries_tcn_forward(x, params):
    """x: (B, C_in, L)  (PyTorch NCW).  Returns (v_i, feat)."""
    B, _, L = x.shape
    z = tcn_forward(x, params["blocks"])                   # (C_last, B*L)
    c_last = z.shape[0]
    # z[:, b*L + t] == z_i[b, :, t]  ->  feat == z_i.permute(0, 2, 1)
    feat = jnp.transpose(z.reshape(c_last, B, L), (1, 2, 0))   # (B, L, C_last)
    out = feat.reshape(B, -1)                              # (B, L*C_last)
    v_i = projection(out, params["proj"])
    return v_i, feat


# ---------------------------------------------------------------------------
# Deterministic synthetic parameters
# (conv weights stored as (K, C_out, C_in) -- PyTorch's (C_out, C_in, K) with
#  the tap axis moved to the front; conv biases as (C_out, 1); linear weights
#  as (in, out), i.e. transposed vs. PyTorch's (out, in).  weight_norm is an
#  init-time reparameterization -> folded into the weights.)
# ---------------------------------------------------------------------------
def init_params(key, input_size, num_channels, kernel_size, win_size,
                proj_size):
    params = {"blocks": [], "proj": {}}
    in_c = input_size
    for out_c in num_channels:
        key, k1, k2, kd = jax.random.split(key, 4)
        blk = {
            "w1": 0.1 * jax.random.normal(
                k1, (kernel_size, out_c, in_c), jnp.float32),
            "b1": jnp.full((out_c, 1), 0.01, jnp.float32),
            "w2": 0.1 * jax.random.normal(
                k2, (kernel_size, out_c, out_c), jnp.float32),
            "b2": jnp.full((out_c, 1), -0.01, jnp.float32),
        }
        if in_c != out_c:   # downsample 1x1 conv only exists when shapes differ
            blk["wd"] = 0.1 * jax.random.normal(kd, (out_c, in_c), jnp.float32)
            blk["bd"] = jnp.zeros((out_c, 1), jnp.float32)
        params["blocks"].append(blk)
        in_c = out_c

    feat_size = num_channels[-1] * win_size
    key, k1, k2, k3 = jax.random.split(key, 4)
    params["proj"] = {
        "w1": jax.random.normal(k1, (feat_size, feat_size), jnp.float32)
              / jnp.sqrt(feat_size),
        "b1": jnp.zeros((1, feat_size), jnp.float32),
        "w2": jax.random.normal(k2, (feat_size, feat_size // 2), jnp.float32)
              / jnp.sqrt(feat_size),
        "b2": jnp.zeros((1, feat_size // 2), jnp.float32),
        "w3": jax.random.normal(k3, (feat_size // 2, proj_size), jnp.float32)
              / jnp.sqrt(feat_size // 2),
        "b3": jnp.zeros((1, proj_size), jnp.float32),
    }
    return params


# ---------------------------------------------------------------------------
if __name__ == "__main__":
    B = 2
    input_size = 4
    win_size = 16
    num_channels = [8, 8]
    kernel_size = 3
    proj_size = 8

    key = jax.random.PRNGKey(0)
    kx, kp = jax.random.split(key)
    # PyTorch Conv1d input layout: (batch, input_size, win_size)
    x = jax.random.normal(kx, (B, input_size, win_size), dtype=jnp.float32)
    params = init_params(kp, input_size, num_channels, kernel_size,
                         win_size, proj_size)

    fwd = jax.jit(timeseries_tcn_forward)
    v_i, feat = fwd(x, params)
    jax.block_until_ready((v_i, feat))

    assert v_i.shape == (B, proj_size), v_i.shape
    assert feat.shape == (B, win_size, num_channels[-1]), feat.shape
    assert v_i.dtype == jnp.float32 and feat.dtype == jnp.float32
    assert bool(jnp.all(jnp.isfinite(v_i))) and bool(jnp.all(jnp.isfinite(feat)))
    print("KERNEL_OK")
</pallas_src>

<mosaic_0001>
module attributes {stable_mosaic.version = 11 : i64} {
  func.func @kernel(%arg0: i32, %arg1: memref<4x32xf32, #tpu.memory_space<vmem>>, %arg2: memref<1x32xi32, #tpu.memory_space<vmem>>, %arg3: memref<3x8x4xbf16, #tpu.memory_space<vmem>>, %arg4: memref<8x1xf32, #tpu.memory_space<vmem>>, %arg5: memref<3x8x8xbf16, #tpu.memory_space<vmem>>, %arg6: memref<8x1xf32, #tpu.memory_space<vmem>>, %arg7: memref<8x4xbf16, #tpu.memory_space<vmem>>, %arg8: memref<8x1xf32, #tpu.memory_space<vmem>>, %arg9: memref<3x8x8xbf16, #tpu.memory_space<vmem>>, %arg10: memref<8x1xf32, #tpu.memory_space<vmem>>, %arg11: memref<3x8x8xbf16, #tpu.memory_space<vmem>>, %arg12: memref<8x1xf32, #tpu.memory_space<vmem>>, %arg13: memref<8x32xf32, #tpu.memory_space<vmem>>) attributes {dimension_semantics = [#tpu.dimension_semantics<parallel>], iteration_bounds = array<i64: 1>, scalar_prefetch = 0 : i64, scratch_operands = 0 : i64, tpu.core_type = #tpu.core_type<tc>, window_params = [{transform_indices = @transform_0, window_bounds = array<i64: 4, 32>}, {pipeline_mode = #tpu.pipeline_mode<synchronous>, transform_indices = @transform_1, window_bounds = array<i64: 1, 32>}, {pipeline_mode = #tpu.pipeline_mode<synchronous>, transform_indices = @transform_2, window_bounds = array<i64: 3, 8, 4>}, {pipeline_mode = #tpu.pipeline_mode<synchronous>, transform_indices = @transform_3, window_bounds = array<i64: 8, 1>}, {pipeline_mode = #tpu.pipeline_mode<synchronous>, transform_indices = @transform_4, window_bounds = array<i64: 3, 8, 8>}, {pipeline_mode = #tpu.pipeline_mode<synchronous>, transform_indices = @transform_5, window_bounds = array<i64: 8, 1>}, {pipeline_mode = #tpu.pipeline_mode<synchronous>, transform_indices = @transform_6, window_bounds = array<i64: 8, 4>}, {pipeline_mode = #tpu.pipeline_mode<synchronous>, transform_indices = @transform_7, window_bounds = array<i64: 8, 1>}, {pipeline_mode = #tpu.pipeline_mode<synchronous>, transform_indices = @transform_8, window_bounds = array<i64: 3, 8, 8>}, {pipeline_mode = #tpu.pipeline_mode<synchronous>, transform_indices = @transform_9, window_bounds = array<i64: 8, 1>}, {pipeline_mode = #tpu.pipeline_mode<synchronous>, transform_indices = @transform_10, window_bounds = array<i64: 3, 8, 8>}, {pipeline_mode = #tpu.pipeline_mode<synchronous>, transform_indices = @transform_11, window_bounds = array<i64: 8, 1>}, {transform_indices = @transform_12, window_bounds = array<i64: 8, 32>}]} {
    %c0 = arith.constant 0 : index
    %c0_0 = arith.constant 0 : index
    %0 = vector.load %arg2[%c0, %c0_0] : memref<1x32xi32, #tpu.memory_space<vmem>>, vector<1x32xi32>
    %c0_1 = arith.constant 0 : index
    %c0_2 = arith.constant 0 : index
    %1 = vector.load %arg1[%c0_1, %c0_2] : memref<4x32xf32, #tpu.memory_space<vmem>>, vector<4x32xf32>
    %cst = arith.constant 0.000000e+00 : f32
    %2 = vector.broadcast %cst : f32 to vector<8x32xf32>
    %c2_i32 = arith.constant 2 : i32
    %3 = tpu.dynamic_rotate %1 by %c2_i32 dim 1 : vector<4x32xf32>, i32 -> vector<4x32xf32>
    %c2_i32_3 = arith.constant 2 : i32
    %4 = vector.broadcast %c2_i32_3 : i32 to vector<1x32xi32>
    %5 = arith.cmpi sge, %0, %4 : vector<1x32xi32>
    %cst_4 = arith.constant 0.000000e+00 : f32
    %6 = vector.shape_cast %5 : vector<1x32xi1> to vector<1x32xi1>
    %7 = vector.broadcast %6 : vector<1x32xi1> to vector<4x32xi1>
    %8 = vector.broadcast %cst_4 : f32 to vector<4x32xf32>
    %9 = arith.select %7, %3, %8 : vector<4x32xi1>, vector<4x32xf32>
    %10 = arith.truncf %9 : vector<4x32xf32> to vector<4x32xbf16>
    %c0_5 = arith.constant 0 : index
    %c0_6 = arith.constant 0 : index
    %c0_7 = arith.constant 0 : index
    %11 = vector.load %arg3[%c0_5, %c0_6, %c0_7] : memref<3x8x4xbf16, #tpu.memory_space<vmem>>, vector<1x8x4xbf16>
    %12 = vector.shape_cast %11 : vector<1x8x4xbf16> to vector<8x4xbf16>
    %cst_8 = arith.constant dense<0.000000e+00> : vector<8x32xf32>
    %13 = tpu.matmul %12, %10, %cst_8 {dimension_numbers = #tpu.dot_dimension_numbers<[1], [0], [0], [1], [0, 0, 1, 1], [], []>} : vector<8x4xbf16>, vector<4x32xbf16>, vector<8x32xf32> -> vector<8x32xf32>
    %14 = arith.addf %2, %13 : vector<8x32xf32>
    %c1_i32 = arith.constant 1 : i32
    %15 = tpu.dynamic_rotate %1 by %c1_i32 dim 1 : vector<4x32xf32>, i32 -> vector<4x32xf32>
    %c1_i32_9 = arith.constant 1 : i32
    %16 = vector.broadcast %c1_i32_9 : i32 to vector<1x32xi32>
    %17 = arith.cmpi sge, %0, %16 : vector<1x32xi32>
    %cst_10 = arith.constant 0.000000e+00 : f32
    %18 = vector.shape_cast %17 : vector<1x32xi1> to vector<1x32xi1>
    %19 = vector.broadcast %18 : vector<1x32xi1> to vector<4x32xi1>
    %20 = vector.broadcast %cst_10 : f32 to vector<4x32xf32>
    %21 = arith.select %19, %15, %20 : vector<4x32xi1>, vector<4x32xf32>
    %22 = arith.truncf %21 : vector<4x32xf32> to vector<4x32xbf16>
    %c1 = arith.constant 1 : index
    %c0_11 = arith.constant 0 : index
    %c0_12 = arith.constant 0 : index
    %23 = vector.load %arg3[%c1, %c0_11, %c0_12] : memref<3x8x4xbf16, #tpu.memory_space<vmem>>, vector<1x8x4xbf16>
    %24 = vector.shape_cast %23 : vector<1x8x4xbf16> to vector<8x4xbf16>
    %cst_13 = arith.constant dense<0.000000e+00> : vector<8x32xf32>
    %25 = tpu.matmul %24, %22, %cst_13 {dimension_numbers = #tpu.dot_dimension_numbers<[1], [0], [0], [1], [0, 0, 1, 1], [], []>} : vector<8x4xbf16>, vector<4x32xbf16>, vector<8x32xf32> -> vector<8x32xf32>
    %26 = arith.addf %14, %25 : vector<8x32xf32>
    %27 = arith.truncf %1 : vector<4x32xf32> to vector<4x32xbf16>
    %c2 = arith.constant 2 : index
    %c0_14 = arith.constant 0 : index
    %c0_15 = arith.constant 0 : index
    %28 = vector.load %arg3[%c2, %c0_14, %c0_15] : memref<3x8x4xbf16, #tpu.memory_space<vmem>>, vector<1x8x4xbf16>
    %29 = vector.shape_cast %28 : vector<1x8x4xbf16> to vector<8x4xbf16>
    %cst_16 = arith.constant dense<0.000000e+00> : vector<8x32xf32>
    %30 = tpu.matmul %29, %27, %cst_16 {dimension_numbers = #tpu.dot_dimension_numbers<[1], [0], [0], [1], [0, 0, 1, 1], [], []>} : vector<8x4xbf16>, vector<4x32xbf16>, vector<8x32xf32> -> vector<8x32xf32>
    %31 = arith.addf %26, %30 : vector<8x32xf32>
    %c0_17 = arith.constant 0 : index
    %c0_18 = arith.constant 0 : index
    %32 = vector.load %arg4[%c0_17, %c0_18] : memref<8x1xf32, #tpu.memory_space<vmem>>, vector<8x1xf32>
    %33 = vector.broadcast %32 : vector<8x1xf32> to vector<8x32xf32>
    %34 = arith.addf %31, %33 : vector<8x32xf32>
    %cst_19 = arith.constant 0.000000e+00 : f32
    %35 = vector.broadcast %cst_19 : f32 to vector<8x32xf32>
    %36 = arith.maximumf %34, %35 : vector<8x32xf32>
    %cst_20 = arith.constant 0.000000e+00 : f32
    %37 = vector.broadcast %cst_20 : f32 to vector<8x32xf32>
    %c2_i32_21 = arith.constant 2 : i32
    %38 = tpu.dynamic_rotate %36 by %c2_i32_21 dim 1 : vector<8x32xf32>, i32 -> vector<8x32xf32>
    %cst_22 = arith.constant 0.000000e+00 : f32
    %39 = vector.shape_cast %5 : vector<1x32xi1> to vector<1x32xi1>
    %40 = vector.broadcast %39 : vector<1x32xi1> to vector<8x32xi1>
    %41 = vector.broadcast %cst_22 : f32 to vector<8x32xf32>
    %42 = arith.select %40, %38, %41 : vector<8x32xi1>, vector<8x32xf32>
    %43 = arith.truncf %42 : vector<8x32xf32> to vector<8x32xbf16>
    %c0_23 = arith.constant 0 : index
    %c0_24 = arith.constant 0 : index
    %c0_25 = arith.constant 0 : index
    %44 = vector.load %arg5[%c0_23, %c0_24, %c0_25] : memref<3x8x8xbf16, #tpu.memory_space<vmem>>, vector<1x8x8xbf16>
    %45 = vector.shape_cast %44 : vector<1x8x8xbf16> to vector<8x8xbf16>
    %cst_26 = arith.constant dense<0.000000e+00> : vector<8x32xf32>
    %46 = tpu.matmul %45, %43, %cst_26 {dimension_numbers = #tpu.dot_dimension_numbers<[1], [0], [0], [1], [0, 0, 1, 1], [], []>} : vector<8x8xbf16>, vector<8x32xbf16>, vector<8x32xf32> -> vector<8x32xf32>
    %47 = arith.addf %37, %46 : vector<8x32xf32>
    %c1_i32_27 = arith.constant 1 : i32
    %48 = tpu.dynamic_rotate %36 by %c1_i32_27 dim 1 : vector<8x32xf32>, i32 -> vector<8x32xf32>
    %cst_28 = arith.constant 0.000000e+00 : f32
    %49 = vector.shape_cast %17 : vector<1x32xi1> to vector<1x32xi1>
    %50 = vector.broadcast %49 : vector<1x32xi1> to vector<8x32xi1>
    %51 = vector.broadcast %cst_28 : f32 to vector<8x32xf32>
    %52 = arith.select %50, %48, %51 : vector<8x32xi1>, vector<8x32xf32>
    %53 = arith.truncf %52 : vector<8x32xf32> to vector<8x32xbf16>
    %c1_29 = arith.constant 1 : index
    %c0_30 = arith.constant 0 : index
    %c0_31 = arith.constant 0 : index
    %54 = vector.load %arg5[%c1_29, %c0_30, %c0_31] : memref<3x8x8xbf16, #tpu.memory_space<vmem>>, vector<1x8x8xbf16>
    %55 = vector.shape_cast %54 : vector<1x8x8xbf16> to vector<8x8xbf16>
    %cst_32 = arith.constant dense<0.000000e+00> : vector<8x32xf32>
    %56 = tpu.matmul %55, %53, %cst_32 {dimension_numbers = #tpu.dot_dimension_numbers<[1], [0], [0], [1], [0, 0, 1, 1], [], []>} : vector<8x8xbf16>, vector<8x32xbf16>, vector<8x32xf32> -> vector<8x32xf32>
    %57 = arith.addf %47, %56 : vector<8x32xf32>
    %58 = arith.truncf %36 : vector<8x32xf32> to vector<8x32xbf16>
    %c2_33 = arith.constant 2 : index
    %c0_34 = arith.constant 0 : index
    %c0_35 = arith.constant 0 : index
    %59 = vector.load %arg5[%c2_33, %c0_34, %c0_35] : memref<3x8x8xbf16, #tpu.memory_space<vmem>>, vector<1x8x8xbf16>
    %60 = vector.shape_cast %59 : vector<1x8x8xbf16> to vector<8x8xbf16>
    %cst_36 = arith.constant dense<0.000000e+00> : vector<8x32xf32>
    %61 = tpu.matmul %60, %58, %cst_36 {dimension_numbers = #tpu.dot_dimension_numbers<[1], [0], [0], [1], [0, 0, 1, 1], [], []>} : vector<8x8xbf16>, vector<8x32xbf16>, vector<8x32xf32> -> vector<8x32xf32>
    %62 = arith.addf %57, %61 : vector<8x32xf32>
    %c0_37 = arith.constant 0 : index
    %c0_38 = arith.constant 0 : index
    %63 = vector.load %arg6[%c0_37, %c0_38] : memref<8x1xf32, #tpu.memory_space<vmem>>, vector<8x1xf32>
    %64 = vector.broadcast %63 : vector<8x1xf32> to vector<8x32xf32>
    %65 = arith.addf %62, %64 : vector<8x32xf32>
    %cst_39 = arith.constant 0.000000e+00 : f32
    %66 = vector.broadcast %cst_39 : f32 to vector<8x32xf32>
    %67 = arith.maximumf %65, %66 : vector<8x32xf32>
    %c0_40 = arith.constant 0 : index
    %c0_41 = arith.constant 0 : index
    %68 = vector.load %arg7[%c0_40, %c0_41] : memref<8x4xbf16, #tpu.memory_space<vmem>>, vector<8x4xbf16>
    %69 = arith.truncf %1 : vector<4x32xf32> to vector<4x32xbf16>
    %cst_42 = arith.constant dense<0.000000e+00> : vector<8x32xf32>
    %70 = tpu.matmul %68, %69, %cst_42 {dimension_numbers = #tpu.dot_dimension_numbers<[1], [0], [0], [1], [0, 0, 1, 1], [], []>} : vector<8x4xbf16>, vector<4x32xbf16>, vector<8x32xf32> -> vector<8x32xf32>
    %c0_43 = arith.constant 0 : index
    %c0_44 = arith.constant 0 : index
    %71 = vector.load %arg8[%c0_43, %c0_44] : memref<8x1xf32, #tpu.memory_space<vmem>>, vector<8x1xf32>
    %72 = vector.broadcast %71 : vector<8x1xf32> to vector<8x32xf32>
    %73 = arith.addf %70, %72 : vector<8x32xf32>
    %74 = arith.addf %67, %73 : vector<8x32xf32>
    %cst_45 = arith.constant 0.000000e+00 : f32
    %75 = vector.broadcast %cst_45 : f32 to vector<8x32xf32>
    %76 = arith.maximumf %74, %75 : vector<8x32xf32>
    %cst_46 = arith.constant 0.000000e+00 : f32
    %77 = vector.broadcast %cst_46 : f32 to vector<8x32xf32>
    %c4_i32 = arith.constant 4 : i32
    %78 = tpu.dynamic_rotate %76 by %c4_i32 dim 1 : vector<8x32xf32>, i32 -> vector<8x32xf32>
    %c4_i32_47 = arith.constant 4 : i32
    %79 = vector.broadcast %c4_i32_47 : i32 to vector<1x32xi32>
    %80 = arith.cmpi sge, %0, %79 : vector<1x32xi32>
    %cst_48 = arith.constant 0.000000e+00 : f32
    %81 = vector.shape_cast %80 : vector<1x32xi1> to vector<1x32xi1>
    %82 = vector.broadcast %81 : vector<1x32xi1> to vector<8x32xi1>
    %83 = vector.broadcast %cst_48 : f32 to vector<8x32xf32>
    %84 = arith.select %82, %78, %83 : vector<8x32xi1>, vector<8x32xf32>
    %85 = arith.truncf %84 : vector<8x32xf32> to vector<8x32xbf16>
    %c0_49 = arith.constant 0 : index
    %c0_50 = arith.constant 0 : index
    %c0_51 = arith.constant 0 : index
    %86 = vector.load %arg9[%c0_49, %c0_50, %c0_51] : memref<3x8x8xbf16, #tpu.memory_space<vmem>>, vector<1x8x8xbf16>
    %87 = vector.shape_cast %86 : vector<1x8x8xbf16> to vector<8x8xbf16>
    %cst_52 = arith.constant dense<0.000000e+00> : vector<8x32xf32>
    %88 = tpu.matmul %87, %85, %cst_52 {dimension_numbers = #tpu.dot_dimension_numbers<[1], [0], [0], [1], [0, 0, 1, 1], [], []>} : vector<8x8xbf16>, vector<8x32xbf16>, vector<8x32xf32> -> vector<8x32xf32>
    %89 = arith.addf %77, %88 : vector<8x32xf32>
    %c2_i32_53 = arith.constant 2 : i32
    %90 = tpu.dynamic_rotate %76 by %c2_i32_53 dim 1 : vector<8x32xf32>, i32 -> vector<8x32xf32>
    %cst_54 = arith.constant 0.000000e+00 : f32
    %91 = vector.shape_cast %5 : vector<1x32xi1> to vector<1x32xi1>
    %92 = vector.broadcast %91 : vector<1x32xi1> to vector<8x32xi1>
    %93 = vector.broadcast %cst_54 : f32 to vector<8x32xf32>
    %94 = arith.select %92, %90, %93 : vector<8x32xi1>, vector<8x32xf32>
    %95 = arith.truncf %94 : vector<8x32xf32> to vector<8x32xbf16>
    %c1_55 = arith.constant 1 : index
    %c0_56 = arith.constant 0 : index
    %c0_57 = arith.constant 0 : index
    %96 = vector.load %arg9[%c1_55, %c0_56, %c0_57] : memref<3x8x8xbf16, #tpu.memory_space<vmem>>, vector<1x8x8xbf16>
    %97 = vector.shape_cast %96 : vector<1x8x8xbf16> to vector<8x8xbf16>
    %cst_58 = arith.constant dense<0.000000e+00> : vector<8x32xf32>
    %98 = tpu.matmul %97, %95, %cst_58 {dimension_numbers = #tpu.dot_dimension_numbers<[1], [0], [0], [1], [0, 0, 1, 1], [], []>} : vector<8x8xbf16>, vector<8x32xbf16>, vector<8x32xf32> -> vector<8x32xf32>
    %99 = arith.addf %89, %98 : vector<8x32xf32>
    %100 = arith.truncf %76 : vector<8x32xf32> to vector<8x32xbf16>
    %c2_59 = arith.constant 2 : index
    %c0_60 = arith.constant 0 : index
    %c0_61 = arith.constant 0 : index
    %101 = vector.load %arg9[%c2_59, %c0_60, %c0_61] : memref<3x8x8xbf16, #tpu.memory_space<vmem>>, vector<1x8x8xbf16>
    %102 = vector.shape_cast %101 : vector<1x8x8xbf16> to vector<8x8xbf16>
    %cst_62 = arith.constant dense<0.000000e+00> : vector<8x32xf32>
    %103 = tpu.matmul %102, %100, %cst_62 {dimension_numbers = #tpu.dot_dimension_numbers<[1], [0], [0], [1], [0, 0, 1, 1], [], []>} : vector<8x8xbf16>, vector<8x32xbf16>, vector<8x32xf32> -> vector<8x32xf32>
    %104 = arith.addf %99, %103 : vector<8x32xf32>
    %c0_63 = arith.constant 0 : index
    %c0_64 = arith.constant 0 : index
    %105 = vector.load %arg10[%c0_63, %c0_64] : memref<8x1xf32, #tpu.memory_space<vmem>>, vector<8x1xf32>
    %106 = vector.broadcast %105 : vector<8x1xf32> to vector<8x32xf32>
    %107 = arith.addf %104, %106 : vector<8x32xf32>
    %cst_65 = arith.constant 0.000000e+00 : f32
    %108 = vector.broadcast %cst_65 : f32 to vector<8x32xf32>
    %109 = arith.maximumf %107, %108 : vector<8x32xf32>
    %cst_66 = arith.constant 0.000000e+00 : f32
    %110 = vector.broadcast %cst_66 : f32 to vector<8x32xf32>
    %c4_i32_67 = arith.constant 4 : i32
    %111 = tpu.dynamic_rotate %109 by %c4_i32_67 dim 1 : vector<8x32xf32>, i32 -> vector<8x32xf32>
    %cst_68 = arith.constant 0.000000e+00 : f32
    %112 = vector.shape_cast %80 : vector<1x32xi1> to vector<1x32xi1>
    %113 = vector.broadcast %112 : vector<1x32xi1> to vector<8x32xi1>
    %114 = vector.broadcast %cst_68 : f32 to vector<8x32xf32>
    %115 = arith.select %113, %111, %114 : vector<8x32xi1>, vector<8x32xf32>
    %116 = arith.truncf %115 : vector<8x32xf32> to vector<8x32xbf16>
    %c0_69 = arith.constant 0 : index
    %c0_70 = arith.constant 0 : index
    %c0_71 = arith.constant 0 : index
    %117 = vector.load %arg11[%c0_69, %c0_70, %c0_71] : memref<3x8x8xbf16, #tpu.memory_space<vmem>>, vector<1x8x8xbf16>
    %118 = vector.shape_cast %117 : vector<1x8x8xbf16> to vector<8x8xbf16>
    %cst_72 = arith.constant dense<0.000000e+00> : vector<8x32xf32>
    %119 = tpu.matmul %118, %116, %cst_72 {dimension_numbers = #tpu.dot_dimension_numbers<[1], [0], [0], [1], [0, 0, 1, 1], [], []>} : vector<8x8xbf16>, vector<8x32xbf16>, vector<8x32xf32> -> vector<8x32xf32>
    %120 = arith.addf %110, %119 : vector<8x32xf32>
    %c2_i32_73 = arith.constant 2 : i32
    %121 = tpu.dynamic_rotate %109 by %c2_i32_73 dim 1 : vector<8x32xf32>, i32 -> vector<8x32xf32>
    %cst_74 = arith.constant 0.000000e+00 : f32
    %122 = vector.shape_cast %5 : vector<1x32xi1> to vector<1x32xi1>
    %123 = vector.broadcast %122 : vector<1x32xi1> to vector<8x32xi1>
    %124 = vector.broadcast %cst_74 : f32 to vector<8x32xf32>
    %125 = arith.select %123, %121, %124 : vector<8x32xi1>, vector<8x32xf32>
    %126 = arith.truncf %125 : vector<8x32xf32> to vector<8x32xbf16>
    %c1_75 = arith.constant 1 : index
    %c0_76 = arith.constant 0 : index
    %c0_77 = arith.constant 0 : index
    %127 = vector.load %arg11[%c1_75, %c0_76, %c0_77] : memref<3x8x8xbf16, #tpu.memory_space<vmem>>, vector<1x8x8xbf16>
    %128 = vector.shape_cast %127 : vector<1x8x8xbf16> to vector<8x8xbf16>
    %cst_78 = arith.constant dense<0.000000e+00> : vector<8x32xf32>
    %129 = tpu.matmul %128, %126, %cst_78 {dimension_numbers = #tpu.dot_dimension_numbers<[1], [0], [0], [1], [0, 0, 1, 1], [], []>} : vector<8x8xbf16>, vector<8x32xbf16>, vector<8x32xf32> -> vector<8x32xf32>
    %130 = arith.addf %120, %129 : vector<8x32xf32>
    %131 = arith.truncf %109 : vector<8x32xf32> to vector<8x32xbf16>
    %c2_79 = arith.constant 2 : index
    %c0_80 = arith.constant 0 : index
    %c0_81 = arith.constant 0 : index
    %132 = vector.load %arg11[%c2_79, %c0_80, %c0_81] : memref<3x8x8xbf16, #tpu.memory_space<vmem>>, vector<1x8x8xbf16>
    %133 = vector.shape_cast %132 : vector<1x8x8xbf16> to vector<8x8xbf16>
    %cst_82 = arith.constant dense<0.000000e+00> : vector<8x32xf32>
    %134 = tpu.matmul %133, %131, %cst_82 {dimension_numbers = #tpu.dot_dimension_numbers<[1], [0], [0], [1], [0, 0, 1, 1], [], []>} : vector<8x8xbf16>, vector<8x32xbf16>, vector<8x32xf32> -> vector<8x32xf32>
    %135 = arith.addf %130, %134 : vector<8x32xf32>
    %c0_83 = arith.constant 0 : index
    %c0_84 = arith.constant 0 : index
    %136 = vector.load %arg12[%c0_83, %c0_84] : memref<8x1xf32, #tpu.memory_space<vmem>>, vector<8x1xf32>
    %137 = vector.broadcast %136 : vector<8x1xf32> to vector<8x32xf32>
    %138 = arith.addf %135, %137 : vector<8x32xf32>
    %cst_85 = arith.constant 0.000000e+00 : f32
    %139 = vector.broadcast %cst_85 : f32 to vector<8x32xf32>
    %140 = arith.maximumf %138, %139 : vector<8x32xf32>
    %141 = arith.addf %140, %76 : vector<8x32xf32>
    %cst_86 = arith.constant 0.000000e+00 : f32
    %142 = vector.broadcast %cst_86 : f32 to vector<8x32xf32>
    %143 = arith.maximumf %141, %142 : vector<8x32xf32>
    %c0_87 = arith.constant 0 : index
    %c0_88 = arith.constant 0 : index
    %144 = vector.load %arg13[%c0_87, %c0_88] : memref<8x32xf32, #tpu.memory_space<vmem>>, vector<8x32xf32>
    tpu.vector_store %arg13[%c0_87, %c0_88], %143 {strides = array<i32>} : memref<8x32xf32, #tpu.memory_space<vmem>>, vector<8x32xf32>,
    return
  }
  func.func @transform_0(%arg0: i32) -> (i32, i32) {
    %c0_i32 = arith.constant 0 : i32
    %c0_i32_0 = arith.constant 0 : i32
    return %c0_i32, %arg0 : i32, i32
  }
  func.func @transform_1(%arg0: i32) -> (i32, i32) {
    %c0_i32 = arith.constant 0 : i32
    %c0_i32_0 = arith.constant 0 : i32
    %c0_i32_1 = arith.constant 0 : i32
    return %c0_i32, %c0_i32_0 : i32, i32
  }
  func.func @transform_2(%arg0: i32) -> (i32, i32, i32) {
    %c0_i32 = arith.constant 0 : i32
    %c0_i32_0 = arith.constant 0 : i32
    %c0_i32_1 = arith.constant 0 : i32
    %c0_i32_2 = arith.constant 0 : i32
    return %c0_i32, %c0_i32_0, %c0_i32_1 : i32, i32, i32
  }
  func.func @transform_3(%arg0: i32) -> (i32, i32) {
    %c0_i32 = arith.constant 0 : i32
    %c0_i32_0 = arith.constant 0 : i32
    %c0_i32_1 = arith.constant 0 : i32
    return %c0_i32, %c0_i32_0 : i32, i32
  }
  func.func @transform_4(%arg0: i32) -> (i32, i32, i32) {
    %c0_i32 = arith.constant 0 : i32
    %c0_i32_0 = arith.constant 0 : i32
    %c0_i32_1 = arith.constant 0 : i32
    %c0_i32_2 = arith.constant 0 : i32
    return %c0_i32, %c0_i32_0, %c0_i32_1 : i32, i32, i32
  }
  func.func @transform_5(%arg0: i32) -> (i32, i32) {
    %c0_i32 = arith.constant 0 : i32
    %c0_i32_0 = arith.constant 0 : i32
    %c0_i32_1 = arith.constant 0 : i32
    return %c0_i32, %c0_i32_0 : i32, i32
  }
  func.func @transform_6(%arg0: i32) -> (i32, i32) {
    %c0_i32 = arith.constant 0 : i32
    %c0_i32_0 = arith.constant 0 : i32
    %c0_i32_1 = arith.constant 0 : i32
    return %c0_i32, %c0_i32_0 : i32, i32
  }
  func.func @transform_7(%arg0: i32) -> (i32, i32) {
    %c0_i32 = arith.constant 0 : i32
    %c0_i32_0 = arith.constant 0 : i32
    %c0_i32_1 = arith.constant 0 : i32
    return %c0_i32, %c0_i32_0 : i32, i32
  }
  func.func @transform_8(%arg0: i32) -> (i32, i32, i32) {
    %c0_i32 = arith.constant 0 : i32
    %c0_i32_0 = arith.constant 0 : i32
    %c0_i32_1 = arith.constant 0 : i32
    %c0_i32_2 = arith.constant 0 : i32
    return %c0_i32, %c0_i32_0, %c0_i32_1 : i32, i32, i32
  }
  func.func @transform_9(%arg0: i32) -> (i32, i32) {
    %c0_i32 = arith.constant 0 : i32
    %c0_i32_0 = arith.constant 0 : i32
    %c0_i32_1 = arith.constant 0 : i32
    return %c0_i32, %c0_i32_0 : i32, i32
  }
  func.func @transform_10(%arg0: i32) -> (i32, i32, i32) {
    %c0_i32 = arith.constant 0 : i32
    %c0_i32_0 = arith.constant 0 : i32
    %c0_i32_1 = arith.constant 0 : i32
    %c0_i32_2 = arith.constant 0 : i32
    return %c0_i32, %c0_i32_0, %c0_i32_1 : i32, i32, i32
  }
  func.func @transform_11(%arg0: i32) -> (i32, i32) {
    %c0_i32 = arith.constant 0 : i32
    %c0_i32_0 = arith.constant 0 : i32
    %c0_i32_1 = arith.constant 0 : i32
    return %c0_i32, %c0_i32_0 : i32, i32
  }
  func.func @transform_12(%arg0: i32) -> (i32, i32) {
    %c0_i32 = arith.constant 0 : i32
    %c0_i32_0 = arith.constant 0 : i32
    return %c0_i32, %arg0 : i32, i32
  }
}

module attributes {stable_mosaic.version = 11 : i64} {
  func.func @projection_kernel(%arg0: memref<2x128xf32, #tpu.memory_space<vmem>>, %arg1: memref<128x128xbf16, #tpu.memory_space<vmem>>, %arg2: memref<1x128xf32, #tpu.memory_space<vmem>>, %arg3: memref<128x64xbf16, #tpu.memory_space<vmem>>, %arg4: memref<1x64xf32, #tpu.memory_space<vmem>>, %arg5: memref<64x8xbf16, #tpu.memory_space<vmem>>, %arg6: memref<1x8xf32, #tpu.memory_space<vmem>>, %arg7: memref<2x8xf32, #tpu.memory_space<vmem>>) attributes {dimension_semantics = [], scalar_prefetch = 0 : i64, scratch_operands = 0 : i64, tpu.core_type = #tpu.core_type<tc>} {
    %c0 = arith.constant 0 : index
    %c0_0 = arith.constant 0 : index
    %0 = vector.load %arg0[%c0, %c0_0] : memref<2x128xf32, #tpu.memory_space<vmem>>, vector<2x128xf32>
    %1 = arith.truncf %0 : vector<2x128xf32> to vector<2x128xbf16>
    %c0_1 = arith.constant 0 : index
    %c0_2 = arith.constant 0 : index
    %2 = vector.load %arg1[%c0_1, %c0_2] : memref<128x128xbf16, #tpu.memory_space<vmem>>, vector<128x128xbf16>
    %cst = arith.constant dense<0.000000e+00> : vector<2x128xf32>
    %3 = tpu.matmul %1, %2, %cst {dimension_numbers = #tpu.dot_dimension_numbers<[1], [0], [0], [1], [0, 0, 1, 1], [], []>} : vector<2x128xbf16>, vector<128x128xbf16>, vector<2x128xf32> -> vector<2x128xf32>
    %c0_3 = arith.constant 0 : index
    %c0_4 = arith.constant 0 : index
    %4 = vector.load %arg2[%c0_3, %c0_4] : memref<1x128xf32, #tpu.memory_space<vmem>>, vector<1x128xf32>
    %5 = vector.broadcast %4 : vector<1x128xf32> to vector<2x128xf32>
    %6 = arith.addf %3, %5 : vector<2x128xf32>
    %cst_5 = arith.constant 0.000000e+00 : f32
    %7 = vector.broadcast %cst_5 : f32 to vector<2x128xf32>
    %8 = arith.maximumf %6, %7 : vector<2x128xf32>
    %9 = arith.truncf %8 : vector<2x128xf32> to vector<2x128xbf16>
    %c0_6 = arith.constant 0 : index
    %c0_7 = arith.constant 0 : index
    %10 = vector.load %arg3[%c0_6, %c0_7] : memref<128x64xbf16, #tpu.memory_space<vmem>>, vector<128x64xbf16>
    %cst_8 = arith.constant dense<0.000000e+00> : vector<2x64xf32>
    %11 = tpu.matmul %9, %10, %cst_8 {dimension_numbers = #tpu.dot_dimension_numbers<[1], [0], [0], [1], [0, 0, 1, 1], [], []>} : vector<2x128xbf16>, vector<128x64xbf16>, vector<2x64xf32> -> vector<2x64xf32>
    %c0_9 = arith.constant 0 : index
    %c0_10 = arith.constant 0 : index
    %12 = vector.load %arg4[%c0_9, %c0_10] : memref<1x64xf32, #tpu.memory_space<vmem>>, vector<1x64xf32>
    %13 = vector.broadcast %12 : vector<1x64xf32> to vector<2x64xf32>
    %14 = arith.addf %11, %13 : vector<2x64xf32>
    %cst_11 = arith.constant 0.000000e+00 : f32
    %15 = vector.broadcast %cst_11 : f32 to vector<2x64xf32>
    %16 = arith.maximumf %14, %15 : vector<2x64xf32>
    %17 = arith.truncf %16 : vector<2x64xf32> to vector<2x64xbf16>
    %c0_12 = arith.constant 0 : index
    %c0_13 = arith.constant 0 : index
    %18 = vector.load %arg5[%c0_12, %c0_13] : memref<64x8xbf16, #tpu.memory_space<vmem>>, vector<64x8xbf16>
    %cst_14 = arith.constant dense<0.000000e+00> : vector<2x8xf32>
    %19 = tpu.matmul %17, %18, %cst_14 {dimension_numbers = #tpu.dot_dimension_numbers<[1], [0], [0], [1], [0, 0, 1, 1], [], []>} : vector<2x64xbf16>, vector<64x8xbf16>, vector<2x8xf32> -> vector<2x8xf32>
    %c0_15 = arith.constant 0 : index
    %c0_16 = arith.constant 0 : index
    %20 = vector.load %arg6[%c0_15, %c0_16] : memref<1x8xf32, #tpu.memory_space<vmem>>, vector<1x8xf32>
    %21 = vector.broadcast %20 : vector<1x8xf32> to vector<2x8xf32>
    %22 = arith.addf %19, %21 : vector<2x8xf32>
    %c0_17 = arith.constant 0 : index
    %c0_18 = arith.constant 0 : index
    %23 = vector.load %arg7[%c0_17, %c0_18] : memref<2x8xf32, #tpu.memory_space<vmem>>, vector<2x8xf32>
    tpu.vector_store %arg7[%c0_17, %c0_18], %22 {strides = array<i32>} : memref<2x8xf32, #tpu.memory_space<vmem>>, vector<2x8xf32>,
    return
  }
}

</mosaic_0001>

<bundles_post_ra>
// kernel: tile.9
= control target key start
LH: loop header
LB: loop body
LE: loop exit
PB: predicated region body
PF: predicated region fallthrough
CT: control target
= control target key end

     0   :  { %vm7_vm0 = vcmask 130048   ;;  %vm13_vm1 = vcmask 261248   ;;  %s39_s0 = inlined_call_operand.vmem [shape: s32[2,16], index: 0, kind: input, shape index: {}]   ;;  %s40_s1 = inlined_call_operand.vmem [shape: s32[1,32], index: 1, kind: output, shape index: {}]  }
   0x1   :  { %v4_v0 = vld [vmem:[%s39_s0] sm:$0x3]  ;;  %s22_s0 = smov 16  }
   0x2   :  { %5 = vst [vmem:[#allocation1] sm:$0x3] %v4_v0 }
   0x9   :  { %v10_v1 = vld [vmem:[#allocation1 + $0x1] sm:$0x1]   ;;  %v6_v2 = vld [vmem:[#allocation1] sm:$0x1]  }
   0xa   :  { %11 = vrot.lane.b32.xlu0 %v10_v1, %s22_s0  ;;  %8 = vst.msk [vmem:[#allocation0] sm:$0x1] %vm7_vm0, %v6_v2  }
  0x7c   :  { %v12_v3 = vpop.permute.xlu0 %11  }
  0x7d   :  { %14 = vst.msk [vmem:[#allocation0] sm:$0x1] %vm13_vm1, %v12_v3  }
  0x84   :  { %v17_v4 = vld [vmem:[#allocation0] sm:$0x1] }
  0x85   :  { %20 = vst [vmem:[%s40_s1] sm:$0x1] %v17_v4 }

// kernel: timeseries_tcn_forward.3
= control target key start
LH: loop header
LB: loop body
LE: loop exit
PB: predicated region body
PF: predicated region fallthrough
CT: control target
= control target key end

     0   :  { %s514_s0 = inlined_call_operand.vmem [shape: f32[2,128], index: 0, kind: input, shape index: {}]   ;;  %s515_s1 = inlined_call_operand.vmem [shape: bf16[128,128], index: 1, kind: input, shape index: {}]   ;;  %s516_s2 = inlined_call_operand.vmem [shape: f32[1,128], index: 2, kind: input, shape index: {}]   ;;  %s517_s3 = inlined_call_operand.vmem [shape: bf16[128,64], index: 3, kind: input, shape index: {}]   ;;  %s518_s4 = inlined_call_operand.vmem [shape: f32[1,64], index: 4, kind: input, shape index: {}]   ;;  %s519_s5 = inlined_call_operand.vmem [shape: bf16[64,8], index: 5, kind: input, shape index: {}]   ;;  %s520_s6 = inlined_call_operand.vmem [shape: f32[1,8], index: 6, kind: input, shape index: {}]   ;;  %s521_s7 = inlined_call_operand.hbm [shape: f32[2,8], index: 7, kind: output, shape index: {}]  }
   0x1   :  { %v355_v0 = vld [vmem:[%s515_s1 + $0x38] sm:$0xff]  ;;  %v354_v1 = vld [vmem:[%s515_s1 + $0x30] sm:$0xff]  ;;  %v353_v4 = vld [vmem:[%s515_s1 + $0x28] sm:$0xff] }
   0x2   :  { %98 = vmatpush.bf16.msra.mxu0 %v355_v0  ;;  %v363_v2 = vld [vmem:[%s517_s3 + $0x38] sm:$0xff]  ;;  %v362_v3 = vld [vmem:[%s517_s3 + $0x30] sm:$0xff] }
   0x3   :  { %181 = vmatpush.bf16.msra.mxu1 %v363_v2 }
   0x6   :  { %99 = vmatpush.bf16.msra.mxu0 %v354_v1 }
   0x7   :  { %12 = vsyncpa [#allocation3], 0  ;;  %182 = vmatpush.bf16.msra.mxu1 %v362_v3  ;;  %v361_v5 = vld [vmem:[%s517_s3 + $0x28] sm:$0xff]  ;;  %v352_v6 = vld [vmem:[%s515_s1 + $0x20] sm:$0xff]  ;;  %vm232_vm0 = vcmask 523264   ;;  %s398_s22 = smov [#allocation2]  }
   0x8   :  { %v360_v7 = vld [vmem:[%s517_s3 + $0x20] sm:$0xff]  ;;  %v351_v8 = vld [vmem:[%s515_s1 + $0x18] sm:$0xff]  ;;  %v350_v10 = vld [vmem:[%s515_s1 + $0x10] sm:$0xff]  ;;  %s256_s23 = sshll.u32 %s398_s22, 4  ;;  %s258_s25 = sshll.u32 %s521_s7, 4  ;;  %vm249_vm1 = vcmask 58368   ;;  %s257_s23 = int_to_ptr.vmem [resolvable:$true] %s256_s23  ;;  %s259_s25 = int_to_ptr.hbm [resolvable:$true] %s258_s25 }
   0x9   :  { %v359_v9 = vld [vmem:[%s517_s3 + $0x18] sm:$0xff]  ;;  %v358_v11 = vld [vmem:[%s517_s3 + $0x10] sm:$0xff]  ;;  %v349_v12 = vld [vmem:[%s515_s1 + $0x8] sm:$0xff] }
   0xa   :  { %100 = vmatpush.bf16.msra.mxu0 %v353_v4  ;;  %v348_v13 = vld [vmem:[%s515_s1] sm:$0xff]  ;;  %v357_v16 = vld [vmem:[%s517_s3 + $0x8] sm:$0xff]  ;;  %v367_v18 = vld [vmem:[%s519_s5 + $0x18] sm:$0xff] }
   0xb   :  { %183 = vmatpush.bf16.msra.mxu1 %v361_v5  ;;  %v28_v14 = vld [vmem:[%s514_s0] sm:$0x3]  ;;  %240 = vmatpush.bf16.msra.mxu2 %v367_v18  ;;  %v366_v19 = vld [vmem:[%s519_s5 + $0x10] sm:$0xff]  ;;  %v365_v26 = vld [vmem:[%s519_s5 + $0x8] sm:$0xff] }
   0xc   :  { %v29_v15 = vpack.c.bf16 %v28_v14, %v28_v14  ;;  %v356_v17 = vld [vmem:[%s517_s3] sm:$0xff] }
   0xd   :  { %v369_v20 = vld [vmem:[%s516_s2] ss:$0 sm:$0xff] }
   0xe   :  { %101 = vmatpush.bf16.msra.mxu0 %v352_v6  ;;  %v364_v27 = vld [vmem:[%s519_s5] sm:$0xff] }
   0xf   :  { %184 = vmatpush.bf16.msra.mxu1 %v360_v7  ;;  %241 = vmatpush.bf16.msra.mxu2 %v366_v19  ;;  %v370_v28 = vld [vmem:[%s518_s4] ss:$0 sm:$0xff] }
  0x10   :  { %v371_v34 = vld [vmem:[%s520_s6] ss:$0 sm:$0xff] }
  0x12   :  { %102 = vmatpush.bf16.msra.mxu0 %v351_v8 }
  0x13   :  { %185 = vmatpush.bf16.msra.mxu1 %v359_v9  ;;  %242 = vmatpush.bf16.msra.mxu2 %v365_v26 }
  0x16   :  { %103 = vmatpush.bf16.msra.mxu0 %v350_v10 }
  0x17   :  { %186 = vmatpush.bf16.msra.mxu1 %v358_v11  ;;  %243 = vmatpush.bf16.msra.mxu2 %v364_v27 }
  0x1a   :  { %104 = vmatpush.bf16.msra.mxu0 %v349_v12 }
  0x1b   :  { %187 = vmatpush.bf16.msra.mxu1 %v357_v16 }
  0x1e   :  { %105 = vmatpush.bf16.msra.mxu0 %v348_v13 }
  0x1f   :  { %188 = vmatpush.bf16.msra.mxu1 %v356_v17 }
  0x21   :  { %106 = vmatmul.bf16.vlgmr.msra.gmra.mxu0 %v29_v15 }
  0x9e   :  { %v107_v21 = vpop.f32.mrf.mxu0 }
  0x9f   :  { %v108_v22 = vadd.f32 %v369_v20, %v107_v21 }
  0xa1   :  { %v111_v23 = vmax.f32 %v108_v22, 0.0 }
  0xa3   :  { %v112_v24 = vpack.c.bf16 %v111_v23, %v111_v23 }
  0xa5   :  { %189 = vmatmul.bf16.vlgmr.msra.gmra.mxu1 %v112_v24 }
  0xa6   :  { %v109_v25 = vpop.f32.mrf.mxu0 }
 0x122   :  { %v190_v29 = vpop.f32.mrf.mxu1 }
 0x123   :  { %v191_v30 = vadd.f32 %v370_v28, %v190_v29 }
 0x125   :  { %v194_v31 = vmax.f32 %v191_v30, 0.0 }
 0x127   :  { %v195_v32 = vpack.c.bf16 %v194_v31, %v194_v31 }
 0x129   :  { %347 = vmatmul.msk.bf16.vlgmr.msra.gmra.mxu2 %vm232_vm0, %v195_v32 }
 0x12a   :  { %v192_v33 = vpop.f32.mrf.mxu1 }
 0x1ac   :  { %v245_v35 = vpop.f32.mrf.mxu2 }
 0x1ad   :  { %v246_v36 = vadd.f32 %v371_v34, %v245_v35 }
 0x1af   :  { %250 = vst.msk [vmem:[#allocation2] sm:$0x3] %vm249_vm1, %v246_v36 }
 0x1b0   :  { %261 = dma.vmem_to_hbm [thread:$0]  %s257_s23, 32, %s259_s25, [#allocation3]  }
 0x1b4   :  { %v247_v37 = vpop.f32.mrf.mxu2 }
 0x1b5   :  { %396 = dma.done.wait [#allocation3], 32  }
 0x1b6   :  { %397 = vsyncadd [#allocation3], 4294967264 }
 0x1b7   :  { %266 = vsyncpa [#allocation3], 1 }

// kernel: timeseries_tcn_forward.2
= control target key start
LH: loop header
LB: loop body
LE: loop exit
PB: predicated region body
PF: predicated region fallthrough
CT: control target
= control target key end

     0   :  { %s479_s23 = smov 32   ;;  %vm44_vm0 = vcmask 1047808   ;;  %v480_v3 = vmov 0   ;;  %s482_s24 = smov 97   ;;  %vm77_vm1 = vcmask 1041408   ;;  %vm73_vm2 = vcmask 31744   ;;  %s708_s0 = inlined_call_operand.vmem [shape: f32[4,32], index: 0, kind: input, shape index: {}]   ;;  %s709_s2 = inlined_call_operand.vmem [shape: bf16[3,8,4], index: 2, kind: input, shape index: {}]   ;;  %s710_s3 = inlined_call_operand.vmem [shape: f32[8,1], index: 3, kind: input, shape index: {}]   ;;  %s711_s1 = inlined_call_operand.vmem [shape: s32[1,32], index: 1, kind: input, shape index: {}]   ;;  %s712_s6 = inlined_call_operand.vmem [shape: bf16[8,4], index: 6, kind: input, shape index: {}]   ;;  %s713_s5 = inlined_call_operand.vmem [shape: f32[8,1], index: 5, kind: input, shape index: {}]   ;;  %s714_s7 = inlined_call_operand.vmem [shape: f32[8,1], index: 7, kind: input, shape index: {}]   ;;  %s715_s4 = inlined_call_operand.vmem [shape: bf16[3,8,8], index: 4, kind: input, shape index: {}]   ;;  %s716_s9 = inlined_call_operand.vmem [shape: f32[8,1], index: 9, kind: input, shape index: {}]   ;;  %s717_s8 = inlined_call_operand.vmem [shape: bf16[3,8,8], index: 8, kind: input, shape index: {}]   ;;  %s718_s11 = inlined_call_operand.vmem [shape: f32[8,1], index: 11, kind: input, shape index: {}]   ;;  %s719_s10 = inlined_call_operand.vmem [shape: bf16[3,8,8], index: 10, kind: input, shape index: {}]   ;;  %s720_s12 = inlined_call_operand.vmem [shape: f32[8,32], index: 12, kind: output, shape index: {}]  }
   0x1   :  { %v43_v0 = vld [vmem:[%s708_s0] sm:$0xf]  ;;  %476 = vset.pattern.permute.xlu2 %v480_v3  ;;  %477 = vset.pattern.permute.xlu0 %v480_v3  ;;  %s481_s0 = smov 98   ;;  %v453_v8 = vld [vmem:[%s709_s2 + $0x8] sm:$0xf]  ;;  %vm168_vm7 = vcmask 1043456  }
   0x2   :  { %45 = vrot.lane.b32.xlu0 %v43_v0, %s479_s23  ;;  %478 = vset.pattern.permute.xlu1 %v480_v3  ;;  %v113_v6 = vpack.c.bf16 %v43_v0, %v43_v0  ;;  %v136_v9 = vld [vmem:[%s710_s3] sm:$0xff]  ;;  %vm164_vm8 = vcmask 64512   ;;  %v458_v45 = vld [vmem:[%s715_s4 + $0x8] sm:$0xf]  ;;  %s483_s25 = smov 100   ;;  %vm444_vm11 = vcmask 261120  }
   0x3   :  { %v572_v10 = vld [vmem:[%s711_s1] sm:$0x1]  ;;  %139 = vperm.xlu2 %476, %v136_v9   ;;  %v450_v26 = vld [vmem:[%s709_s2 + $0x4] sm:$0xf]  ;;  %v464_v21 = vld [vmem:[%s717_s8 + $0x8] sm:$0xf] }
   0x4   :  { %v120_v7 = vsel %vm77_vm1, %v113_v6, 0  ;;  %vm51_vm3 = vcmp.ge.s32.totalorder %v572_v10, 2  ;;  %vm62_vm4 = vcmp.ge.s32.totalorder %v572_v10, 1  ;;  %v61_v20 = vld [vmem:[%s709_s2] sm:$0xf]  ;;  %vm266_vm9 = vcmp.ge.s32.totalorder %v572_v10, 4 }
   0x5   :  { %129 = vmatpush.bf16.msra.mxu2 %v120_v7  ;;  %v52_v11 = vsel %vm51_vm3, 1, %v480_v3  ;;  %v63_v14 = vsel %vm62_vm4, 1, %v480_v3  ;;  %v235_v44 = vld [vmem:[%s712_s6] sm:$0xf]  ;;  %v455_v57 = vld [vmem:[%s715_s4 + $0x4] sm:$0xf] }
   0x6   :  { %v53_v12 = vperm.slane %v52_v11, 0  ;;  %v64_v18 = vperm.slane %v63_v14, 0  ;;  %v227_v47 = vld [vmem:[%s713_s5] sm:$0xff] }
   0x7   :  { %v236_v48 = vld [vmem:[%s714_s7] sm:$0xff] }
   0x8   :  { %454 = vmatmul.msk.bf16.vlgmr.msra.gmra.mxu2 %vm73_vm2, %v453_v8  ;;  %vm577_vm5 = vcmp.eq.s32.totalorder %v53_v12, 1  ;;  %vm588_vm6 = vcmp.eq.s32.totalorder %v64_v18, 1  ;;  %v156_v52 = vld [vmem:[%s715_s4] sm:$0xf] }
   0x9   :  { %252 = vmatpush.bf16.msrb.mxu2 %v120_v7  ;;  %v345_v18 = vld [vmem:[%s716_s9] sm:$0xff] }
   0xa   :  { %v365_v13 = vld [vmem:[%s719_s10] sm:$0xf] }
  0x18   :  { %460 = vmatmul.msk.bf16.vlgmr.msrb.gmra.mxu2 %vm73_vm2, %v235_v44 }
  0x5d   :  { %v140_v33 = vpop.permute.xlu2 %139 }
  0x74   :  { %v46_v1 = vpop.permute.xlu0 %45 }
  0x75   :  { %v47_v2 = vsel %vm44_vm0, %v46_v1, %v43_v0 }
  0x76   :  { %48 = vrot.lane.b32.xlu0 %v47_v2, %s479_s23 }
  0x8b   :  { %v131_v27 = vpop.f32.mrf.mxu2 }
  0x93   :  { %v133_v28 = vpop.f32.mrf.mxu2 }
  0x9b   :  { %v254_v59 = vpop.f32.mrf.mxu2 }
  0xa3   :  { %v256_v62 = vpop.f32.mrf.mxu2 }
  0xe8   :  { %v49_v4 = vpop.permute.xlu0 %48 }
  0xe9   :  { %v50_v5 = vsel %vm44_vm0, %v49_v4, %v43_v0 }
  0xea   :  { %56 = vrot.lane.b32.xlu1 %v50_v5, %s481_s0 }
  0xf2   :  { %66 = vrot.lane.b32.xlu1 %v50_v5, %s482_s24 }
 0x15c   :  { %v57_v15 = vpop.permute.xlu1 %56 }
 0x15d   :  { %v59_v16 = vsel %vm577_vm5, %v57_v15, 0.0 }
 0x15e   :  { %v60_v17 = vpack.c.bf16 %v59_v16, %v59_v16 }
 0x160   :  { %v98_v19 = vsel %vm77_vm1, %v60_v17, 0 }
 0x161   :  { %107 = vmatpush.bf16.msra.mxu1 %v98_v19 }
 0x164   :  { %452 = vmatmul.msk.bf16.vlgmr.msra.gmra.mxu1 %vm73_vm2, %v61_v20  ;;  %v67_v22 = vpop.permute.xlu1 %66 }
 0x165   :  { %v69_v23 = vsel %vm588_vm6, %v67_v22, 0.0 }
 0x166   :  { %v70_v24 = vpack.c.bf16 %v69_v23, %v69_v23 }
 0x168   :  { %v79_v25 = vsel %vm77_vm1, %v70_v24, 0 }
 0x169   :  { %88 = vmatpush.bf16.msra.mxu0 %v79_v25 }
 0x16c   :  { %451 = vmatmul.msk.bf16.vlgmr.msra.gmra.mxu0 %vm73_vm2, %v450_v26  ;;  %v461_v26 = vld [vmem:[%s717_s8 + $0x4] sm:$0xf] }
 0x1e1   :  { %v109_v29 = vpop.f32.mrf.mxu1 }
 0x1e9   :  { %v90_v30 = vpop.f32.mrf.mxu0  ;;  %v111_v31 = vpop.f32.mrf.mxu1 }
 0x1ea   :  { %v110_v32 = vadd.f32 %v109_v29, %v90_v30 }
 0x1ec   :  { %v135_v34 = vadd.f32 %v131_v27, %v110_v32  ;;  %v267_v27 = vsel %vm266_vm9, 1, %v480_v3 }
 0x1ed   :  { %v268_v28 = vperm.slane %v267_v27, 0 }
 0x1ee   :  { %v142_v35 = vadd.f32 %v140_v33, %v135_v34  ;;  %v276_v34 = vld [vmem:[%s717_s8] sm:$0xf] }
 0x1ef   :  { %vm665_vm10 = vcmp.eq.s32.totalorder %v268_v28, 1 }
 0x1f0   :  { %v143_v36 = vmax.f32 %v142_v35, 0.0 }
 0x1f1   :  { %v92_v37 = vpop.f32.mrf.mxu0 }
 0x1f2   :  { %144 = vrot.lane.b32.xlu2 %v143_v36, %s479_s23  ;;  %v204_v38 = vpack.c.bf16 %v143_v36, %v143_v36 }
 0x1f4   :  { %v211_v39 = vsel %vm168_vm7, %v204_v38, 0 }
 0x1f5   :  { %220 = vmatpush.bf16.msrb.mxu1 %v211_v39 }
 0x1f8   :  { %459 = vmatmul.msk.bf16.vlgmr.msrb.gmra.mxu1 %vm164_vm8, %v458_v45 }
 0x24c   :  { %v145_v40 = vpop.permute.xlu2 %144 }
 0x24d   :  { %v146_v41 = vsel %vm44_vm0, %v145_v40, %v143_v36 }
 0x24e   :  { %147 = vrot.lane.b32.xlu0 %v146_v41, %s479_s23 }
 0x256   :  { %230 = vperm.xlu0 %477, %v227_v47  }
 0x275   :  { %v222_v58 = vpop.f32.mrf.mxu1 }
 0x27d   :  { %v224_v61 = vpop.f32.mrf.mxu1 }
 0x2c0   :  { %v148_v42 = vpop.permute.xlu0 %147 }
 0x2c1   :  { %v149_v43 = vsel %vm44_vm0, %v148_v42, %v143_v36 }
 0x2c2   :  { %151 = vrot.lane.b32.xlu2 %v149_v43, %s481_s0  ;;  %157 = vrot.lane.b32.xlu1 %v149_v43, %s482_s24 }
 0x2c8   :  { %v231_v2 = vpop.permute.xlu0 %230 }
 0x2ca   :  { %239 = vperm.xlu1 %478, %v236_v48   ;;  %v434_v48 = vld [vmem:[%s718_s11] sm:$0xff] }
 0x31c   :  { %v152_v46 = vpop.permute.xlu2 %151 }
 0x31d   :  { %v154_v49 = vsel %vm577_vm5, %v152_v46, 0.0 }
 0x31e   :  { %v155_v50 = vpack.c.bf16 %v154_v49, %v154_v49 }
 0x320   :  { %v189_v51 = vsel %vm168_vm7, %v155_v50, 0 }
 0x321   :  { %198 = vmatpush.bf16.msrb.mxu0 %v189_v51  ;;  %v469_v51 = vld [vmem:[%s719_s10 + $0x8] sm:$0xf] }
 0x324   :  { %457 = vmatmul.msk.bf16.vlgmr.msrb.gmra.mxu0 %vm164_vm8, %v156_v52 }
 0x334   :  { %v158_v53 = vpop.permute.xlu1 %157 }
 0x335   :  { %v160_v54 = vsel %vm588_vm6, %v158_v53, 0.0 }
 0x336   :  { %v161_v55 = vpack.c.bf16 %v160_v54, %v160_v54 }
 0x338   :  { %v170_v56 = vsel %vm168_vm7, %v161_v55, 0 }
 0x339   :  { %179 = vmatpush.bf16.msra.mxu3 %v170_v56  ;;  %v466_v56 = vld [vmem:[%s719_s10 + $0x4] sm:$0xf] }
 0x33c   :  { %456 = vmatmul.msk.bf16.vlgmr.msra.gmra.mxu3 %vm164_vm8, %v455_v57  ;;  %v240_v4 = vpop.permute.xlu1 %239 }
 0x33d   :  { %v255_v7 = vadd.f32 %v254_v59, %v240_v4 }
 0x3a1   :  { %v200_v60 = vpop.f32.mrf.mxu0 }
 0x3a9   :  { %v202_v63 = vpop.f32.mrf.mxu0 }
 0x3bf   :  { %v181_v0 = vpop.f32.mrf.mxu3 }
 0x3c0   :  { %v201_v1 = vadd.f32 %v200_v60, %v181_v0 }
 0x3c2   :  { %v226_v5 = vadd.f32 %v222_v58, %v201_v1 }
 0x3c4   :  { %v233_v6 = vadd.f32 %v231_v2, %v226_v5 }
 0x3c6   :  { %v234_v8 = vmax.f32 %v233_v6, 0.0 }
 0x3c7   :  { %v183_v9 = vpop.f32.mrf.mxu3 }
 0x3c8   :  { %v258_v11 = vadd.f32 %v255_v7, %v234_v8 }
 0x3ca   :  { %v635_v12 = vmax.f32 %v258_v11, 0.0 }
 0x3cc   :  { %260 = vrot.lane.b32.xlu2 %v635_v12, %s479_s23  ;;  %v322_v14 = vpack.c.bf16 %v635_v12, %v635_v12 }
 0x3ce   :  { %v329_v15 = vsel %vm168_vm7, %v322_v14, 0 }
 0x3cf   :  { %338 = vmatpush.bf16.msra.mxu1 %v329_v15 }
 0x3d2   :  { %465 = vmatmul.msk.bf16.vlgmr.msra.gmra.mxu1 %vm164_vm8, %v464_v21 }
 0x426   :  { %v261_v16 = vpop.permute.xlu2 %260 }
 0x427   :  { %v262_v17 = vsel %vm44_vm0, %v261_v16, %v635_v12 }
 0x428   :  { %263 = vrot.lane.b32.xlu1 %v262_v17, %s479_s23 }
 0x430   :  { %348 = vperm.xlu1 %478, %v345_v18  }
 0x44f   :  { %v340_v3 = vpop.f32.mrf.mxu1 }
 0x457   :  { %v342_v10 = vpop.f32.mrf.mxu1 }
 0x49a   :  { %v264_v19 = vpop.permute.xlu1 %263 }
 0x49b   :  { %v265_v20 = vsel %vm44_vm0, %v264_v19, %v635_v12 }
 0x49c   :  { %271 = vrot.lane.b32.xlu0 %v265_v20, %s483_s25  ;;  %277 = vrot.lane.b32.xlu2 %v265_v20, %s481_s0 }
 0x4a2   :  { %v349_v40 = vpop.permute.xlu1 %348 }
 0x4f6   :  { %v278_v22 = vpop.permute.xlu2 %277 }
 0x4f7   :  { %v280_v23 = vsel %vm577_vm5, %v278_v22, 0.0 }
 0x4f8   :  { %v281_v24 = vpack.c.bf16 %v280_v23, %v280_v23 }
 0x4fa   :  { %v288_v25 = vsel %vm168_vm7, %v281_v24, 0 }
 0x4fb   :  { %297 = vmatpush.bf16.msrb.mxu3 %v288_v25 }
 0x4fe   :  { %462 = vmatmul.msk.bf16.vlgmr.msrb.gmra.mxu3 %vm164_vm8, %v461_v26 }
 0x50e   :  { %v272_v30 = vpop.permute.xlu0 %271 }
 0x50f   :  { %v274_v31 = vsel %vm665_vm10, %v272_v30, 0.0 }
 0x510   :  { %v275_v32 = vpack.c.bf16 %v274_v31, %v274_v31 }
 0x512   :  { %v307_v33 = vsel %vm168_vm7, %v275_v32, 0 }
 0x513   :  { %316 = vmatpush.bf16.msra.mxu0 %v307_v33 }
 0x516   :  { %463 = vmatmul.msk.bf16.vlgmr.msra.gmra.mxu0 %vm164_vm8, %v276_v34 }
 0x581   :  { %v299_v35 = vpop.f32.mrf.mxu3 }
 0x589   :  { %v301_v36 = vpop.f32.mrf.mxu3 }
 0x593   :  { %v318_v37 = vpop.f32.mrf.mxu0 }
 0x594   :  { %v319_v38 = vadd.f32 %v318_v37, %v299_v35 }
 0x596   :  { %v344_v39 = vadd.f32 %v340_v3, %v319_v38 }
 0x598   :  { %v351_v41 = vadd.f32 %v349_v40, %v344_v39 }
 0x59a   :  { %v352_v42 = vmax.f32 %v351_v41, 0.0 }
 0x59b   :  { %v320_v43 = vpop.f32.mrf.mxu0 }
 0x59c   :  { %353 = vrot.lane.b32.xlu2 %v352_v42, %s479_s23  ;;  %v411_v44 = vpack.c.bf16 %v352_v42, %v352_v42 }
 0x59e   :  { %v418_v45 = vsel %vm168_vm7, %v411_v44, 0 }
 0x59f   :  { %427 = vmatpush.bf16.msrb.mxu0 %v418_v45 }
 0x5a2   :  { %470 = vmatmul.msk.bf16.vlgmr.msrb.gmra.mxu0 %vm164_vm8, %v469_v51 }
 0x5f6   :  { %v354_v46 = vpop.permute.xlu2 %353 }
 0x5f7   :  { %v355_v47 = vsel %vm44_vm0, %v354_v46, %v352_v42 }
 0x5f8   :  { %356 = vrot.lane.b32.xlu0 %v355_v47, %s479_s23 }
 0x600   :  { %437 = vperm.xlu0 %477, %v434_v48  }
 0x61f   :  { %v429_v61 = vpop.f32.mrf.mxu0 }
 0x627   :  { %v431_v62 = vpop.f32.mrf.mxu0 }
 0x66a   :  { %v357_v49 = vpop.permute.xlu0 %356 }
 0x66b   :  { %v358_v50 = vsel %vm44_vm0, %v357_v49, %v352_v42 }
 0x66c   :  { %366 = vrot.lane.b32.xlu2 %v358_v50, %s481_s0  ;;  %360 = vrot.lane.b32.xlu1 %v358_v50, %s483_s25 }
 0x672   :  { %v438_v5 = vpop.permute.xlu0 %437 }
 0x6c6   :  { %v367_v52 = vpop.permute.xlu2 %366 }
 0x6c7   :  { %v369_v53 = vsel %vm577_vm5, %v367_v52, 0.0 }
 0x6c8   :  { %v370_v54 = vpack.c.bf16 %v369_v53, %v369_v53 }
 0x6ca   :  { %v377_v55 = vsel %vm168_vm7, %v370_v54, 0 }
 0x6cb   :  { %386 = vmatpush.bf16.msra.mxu2 %v377_v55 }
 0x6ce   :  { %467 = vmatmul.msk.bf16.vlgmr.msra.gmra.mxu2 %vm164_vm8, %v466_v56 }
 0x6de   :  { %v361_v57 = vpop.permute.xlu1 %360 }
 0x6df   :  { %v363_v58 = vsel %vm665_vm10, %v361_v57, 0.0 }
 0x6e0   :  { %v364_v59 = vpack.c.bf16 %v363_v58, %v363_v58 }
 0x6e2   :  { %v396_v60 = vsel %vm168_vm7, %v364_v59, 0 }
 0x6e3   :  { %405 = vmatpush.bf16.msra.mxu3 %v396_v60 }
 0x6e6   :  { %468 = vmatmul.msk.bf16.vlgmr.msra.gmra.mxu3 %vm164_vm8, %v365_v13 }
 0x751   :  { %v388_v63 = vpop.f32.mrf.mxu2 }
 0x759   :  { %v390_v0 = vpop.f32.mrf.mxu2 }
 0x769   :  { %v407_v1 = vpop.f32.mrf.mxu3 }
 0x76a   :  { %v408_v2 = vadd.f32 %v407_v1, %v388_v63 }
 0x76c   :  { %v433_v4 = vadd.f32 %v429_v61, %v408_v2 }
 0x76e   :  { %v440_v6 = vadd.f32 %v438_v5, %v433_v4 }
 0x770   :  { %v441_v7 = vmax.f32 %v440_v6, 0.0 }
 0x771   :  { %v409_v8 = vpop.f32.mrf.mxu3 }
 0x772   :  { %v442_v9 = vadd.f32 %v441_v7, %v635_v12 }
 0x774   :  { %v443_v11 = vmax.f32 %v442_v9, 0.0 }
 0x776   :  { %445 = vst.msk [vmem:[%s720_s12] sm:$0xff] %vm444_vm11, %v443_v11 }

</bundles_post_ra>
